<compile_context>
chip_gen: v6e
topology: v6e:2x2x1
jax: 0.10.0
libtpu: 0.0.40
codegen_flags: <defaults>
</compile_context>

<pallas_src>
import math
import functools

import jax
import jax.numpy as jnp
from jax.experimental import pallas as pl
from jax.experimental.pallas import tpu as pltpu


# ---------------------------------------------------------------------------
# Parameter / buffer setup (plain JAX glue) — mirrors PyTorch __init__
# ---------------------------------------------------------------------------
def make_positional_encoding_table(max_len: int, d_model: int) -> jnp.ndarray:
    """pe[pos, 2i]   = sin(pos / 10000^(2i/d_model))
       pe[pos, 2i+1] = cos(pos / 10000^(2i/d_model))      -> shape (max_len, d_model)"""
    position = jnp.arange(max_len, dtype=jnp.float32)[:, None]            # (max_len, 1)
    div_term = jnp.exp(
        jnp.arange(0, d_model, 2, dtype=jnp.float32) * (-math.log(10000.0) / d_model)
    )                                                                     # (d_model/2,)
    pe = jnp.zeros((max_len, d_model), dtype=jnp.float32)
    pe = pe.at[:, 0::2].set(jnp.sin(position * div_term))
    pe = pe.at[:, 1::2].set(jnp.cos(position * div_term))
    return pe


# ---------------------------------------------------------------------------
# Pallas kernels
# ---------------------------------------------------------------------------
def pe_add_kernel(x_ref, pe_ref, o_ref):
    # x_ref: (TILE_S, B, D), pe_ref: (TILE_S, D) — broadcast over batch.
    o_ref[...] = (x_ref[...] + pe_ref[...][:, None, :]).astype(o_ref.dtype)


def pe_add_dropout_kernel(x_ref, pe_ref, o_ref, *, p, seed):
    # Same add, then inverted dropout with a counter-based hash PRNG.
    # TODO(synk): RNG stream differs from torch.nn.Dropout (different PRNG), so
    # only statistical — not bitwise — equivalence with the PyTorch module.
    tile_s, bsz, dim = x_ref.shape
    y = x_ref[...] + pe_ref[...][:, None, :]

    # Global element index (so every grid tile gets an independent mask).
    row0 = pl.program_id(0) * tile_s
    s_ids = jax.lax.broadcasted_iota(jnp.int32, y.shape, 0) + row0
    b_ids = jax.lax.broadcasted_iota(jnp.int32, y.shape, 1)
    d_ids = jax.lax.broadcasted_iota(jnp.int32, y.shape, 2)
    idx = (s_ids * bsz + b_ids) * dim + d_ids

    # lowbias32 integer hash -> uniform 32-bit values.
    h = idx.astype(jnp.uint32) + jnp.uint32(seed & 0xFFFFFFFF)
    h = (h ^ (h >> 16)) * jnp.uint32(0x7FEB352D)
    h = (h ^ (h >> 15)) * jnp.uint32(0x846CA68B)
    h = h ^ (h >> 16)

    # Integer-domain threshold compare (no float conversion of the bits).
    r31 = (h >> 1).astype(jnp.int32)                       # uniform in [0, 2^31)
    keep = r31 < jnp.int32(int((1.0 - p) * 2147483648.0))
    scale = jnp.float32(1.0 / (1.0 - p))
    o_ref[...] = jnp.where(keep, y * scale, jnp.zeros_like(y)).astype(o_ref.dtype)


# ---------------------------------------------------------------------------
# Wrapper
# ---------------------------------------------------------------------------
def _choose_tile_s(S, B, D, itemsize, target_bytes=2 * 1024 * 1024):
    """Largest multiple-of-8 row tile such that the x tile is ~2 MiB.

    Double-buffered x + out + pe tiles then stay well under the smallest
    default scoped-VMEM budget (16 MiB on v5e; 32 MiB on v6e/v7x), while the
    tile is big enough to amortize per-grid-step overhead (~85% of HBM
    roofline at ~1-2 MiB tiles)."""
    rows = target_bytes // max(1, B * D * itemsize)
    if rows >= S:
        return S
    tile = max(8, (rows // 8) * 8)
    return min(tile, S)


def positional_encoding(x, pe_table, *, p=0.1, training=False, seed=0, tile_s=None):
    """x: (S, B, D). pe_table: (max_len, D). Returns (S, B, D)."""
    S, B, D = x.shape
    pe = pe_table[:S].astype(x.dtype)                      # (S, D), batch dim dropped

    if tile_s is None:
        tile_s = _choose_tile_s(S, B, D, x.dtype.itemsize)
    grid = (pl.cdiv(S, tile_s),)

    # Last two block dims are the full (B, D) extents -> always a legal layout;
    # tiling (and therefore software pipelining) happens along S only.
    in_specs = [
        pl.BlockSpec((tile_s, B, D), lambda i: (i, 0, 0)),   # x tile
        pl.BlockSpec((tile_s, D), lambda i: (i, 0)),          # pe tile (broadcast over B)
    ]
    out_spec = pl.BlockSpec((tile_s, B, D), lambda i: (i, 0, 0))

    # S-axis is embarrassingly parallel -> lets v7x shard it across both TCs.
    cparams = pltpu.CompilerParams(dimension_semantics=("parallel",))

    if (not training) or p <= 0.0:
        kernel = pe_add_kernel                                # dropout is identity in eval
    elif p >= 1.0:
        return jnp.zeros_like(x)                              # everything dropped
    else:
        kernel = functools.partial(pe_add_dropout_kernel, p=float(p), seed=int(seed))

    return pl.pallas_call(
        kernel,
        out_shape=jax.ShapeDtypeStruct((S, B, D), x.dtype),
        grid=grid,
        in_specs=in_specs,
        out_specs=out_spec,
        compiler_params=cparams,
    )(x, pe)


# ---------------------------------------------------------------------------
# Main
# ---------------------------------------------------------------------------
if __name__ == "__main__":
    # --- Test 1: module-default small shape (seq=8, batch=2, embed=32) -------
    S, B, D = 8, 2, 32
    MAX_LEN = 64                                          # stand-in for max_len=5000

    key = jax.random.PRNGKey(0)
    x = jax.random.normal(key, (S, B, D), dtype=jnp.float32)
    pe_table = make_positional_encoding_table(MAX_LEN, D)

    # Eval-mode forward (dropout == identity) — exact match vs reference.
    out = jax.block_until_ready(positional_encoding(x, pe_table, p=0.1, training=False))
    ref = x + pe_table[:S][:, None, :]
    assert out.shape == (S, B, D)
    assert jnp.allclose(out, ref, atol=1e-6), "eval-mode mismatch vs reference"

    # Training-mode forward: every element must be either 0 or (x+pe)/(1-p).
    p_drop = 0.1
    out_tr = jax.block_until_ready(
        positional_encoding(x, pe_table, p=p_drop, training=True, seed=1234)
    )
    assert out_tr.shape == (S, B, D)
    kept_ok = jnp.isclose(out_tr, ref * (1.0 / (1.0 - p_drop)), rtol=1e-5, atol=1e-6)
    drop_ok = out_tr == 0.0
    assert bool(jnp.all(kept_ok | drop_ok)), "training-mode values not in {0, y/(1-p)}"

    # --- Test 2: lane-dense, genuinely tiled path (grid of 3 tiles over S) ---
    S2, B2, D2 = 48, 8, 128
    x2 = jax.random.normal(jax.random.PRNGKey(1), (S2, B2, D2), dtype=jnp.float32)
    pe2 = make_positional_encoding_table(64, D2)
    out2 = jax.block_until_ready(
        positional_encoding(x2, pe2, p=0.1, training=False, tile_s=16)
    )
    ref2 = x2 + pe2[:S2][:, None, :]
    assert jnp.allclose(out2, ref2, atol=1e-6), "tiled eval-mode mismatch vs reference"

    out2_tr = jax.block_until_ready(
        positional_encoding(x2, pe2, p=p_drop, training=True, seed=7, tile_s=16)
    )
    kept2 = jnp.isclose(out2_tr, ref2 * (1.0 / (1.0 - p_drop)), rtol=1e-5, atol=1e-6)
    assert bool(jnp.all(kept2 | (out2_tr == 0.0))), "tiled training-mode values invalid"

    print("KERNEL_OK")
</pallas_src>

<mosaic_0001>
module attributes {stable_mosaic.version = 11 : i64} {
  func.func @pe_add_kernel(%arg0: i32, %arg1: memref<8x2x32xf32, #tpu.memory_space<vmem>>, %arg2: memref<8x32xf32, #tpu.memory_space<vmem>>, %arg3: memref<8x2x32xf32, #tpu.memory_space<vmem>>) attributes {dimension_semantics = [#tpu.dimension_semantics<parallel>], iteration_bounds = array<i64: 1>, scalar_prefetch = 0 : i64, scratch_operands = 0 : i64, tpu.core_type = #tpu.core_type<tc>, window_params = [{transform_indices = @transform_0, window_bounds = array<i64: 8, 2, 32>}, {transform_indices = @transform_1, window_bounds = array<i64: 8, 32>}, {transform_indices = @transform_2, window_bounds = array<i64: 8, 2, 32>}]} {
    %c0 = arith.constant 0 : index
    %c0_0 = arith.constant 0 : index
    %c0_1 = arith.constant 0 : index
    %0 = vector.load %arg1[%c0, %c0_0, %c0_1] : memref<8x2x32xf32, #tpu.memory_space<vmem>>, vector<8x2x32xf32>
    %c0_2 = arith.constant 0 : index
    %c0_3 = arith.constant 0 : index
    %1 = vector.load %arg2[%c0_2, %c0_3] : memref<8x32xf32, #tpu.memory_space<vmem>>, vector<8x32xf32>
    %2 = vector.shape_cast %1 : vector<8x32xf32> to vector<8x1x32xf32>
    %3 = vector.broadcast %2 : vector<8x1x32xf32> to vector<8x2x32xf32>
    %4 = arith.addf %0, %3 : vector<8x2x32xf32>
    %c0_4 = arith.constant 0 : index
    %c0_5 = arith.constant 0 : index
    %c0_6 = arith.constant 0 : index
    %5 = vector.load %arg3[%c0_4, %c0_5, %c0_6] : memref<8x2x32xf32, #tpu.memory_space<vmem>>, vector<8x2x32xf32>
    tpu.vector_store %arg3[%c0_4, %c0_5, %c0_6], %4 {strides = array<i32>} : memref<8x2x32xf32, #tpu.memory_space<vmem>>, vector<8x2x32xf32>,
    return
  }
  func.func @transform_0(%arg0: i32) -> (i32, i32, i32) {
    %c0_i32 = arith.constant 0 : i32
    %c0_i32_0 = arith.constant 0 : i32
    %c0_i32_1 = arith.constant 0 : i32
    return %arg0, %c0_i32, %c0_i32_0 : i32, i32, i32
  }
  func.func @transform_1(%arg0: i32) -> (i32, i32) {
    %c0_i32 = arith.constant 0 : i32
    %c0_i32_0 = arith.constant 0 : i32
    return %arg0, %c0_i32 : i32, i32
  }
  func.func @transform_2(%arg0: i32) -> (i32, i32, i32) {
    %c0_i32 = arith.constant 0 : i32
    %c0_i32_0 = arith.constant 0 : i32
    %c0_i32_1 = arith.constant 0 : i32
    return %arg0, %c0_i32, %c0_i32_0 : i32, i32, i32
  }
}

</mosaic_0001>

<bundles_post_ra>
// kernel: tpu_custom_call.1
= control target key start
LH: loop header
LB: loop body
LE: loop exit
PB: predicated region body
PF: predicated region fallthrough
CT: control target
= control target key end

     0   :  { %7 = vsyncpa [#allocation3], 0  ;;  %s288_s0 = inlined_call_operand.hbm [shape: f32[8,2,32], index: 0, kind: input, shape index: {}]   ;;  %s289_s1 = inlined_call_operand.hbm [shape: f32[8,32], index: 1, kind: input, shape index: {}]   ;;  %s290_s2 = inlined_call_operand.hbm [shape: f32[8,2,32], index: 2, kind: output, shape index: {}]  }
   0x1   :  { %8 = vsyncpa [#allocation6], 0 }
   0x2   :  { %9 = vsyncpa [#allocation4], 0  ;;  %s244_s9 = smov [#allocation2]  }
   0x3   :  { %s15_s10 = sshll.u32 %s244_s9, 4  ;;  %s16_s10 = int_to_ptr.vmem [resolvable:$true] %s15_s10 }
   0x4   :  { %s186_s11 = scalar_lea.vmem %s16_s10, 256  ;;  %p191_p1 = scmp.lt.s32.totalorder %s16_s10, %s16_s10 }
   0x5   :  { %p187_p0 = scmp.ne.s32.totalorder %s16_s10, %s186_s11  ;;  %p192_p2 = scmp.lt.s32.totalorder %s186_s11, %s186_s11 }
   0x7   :  { %p193_p3 = por %p192_p2, %p191_p1 }
   0x9   :  { %p194_p4 = pnand %p193_p3, %p187_p0 }
   0xb   :  { %197 = shalt.err (!%p194_p4)
}
   0xc   :  { %s245_s12 = smov 32   ;;  %s246_s13 = smov 2  }
   0xd   :  { %21 = dma.hbm_to_vmem [thread:$0]  %s288_s0, 256, %s16_s10, [#allocation3], %s245_s12, %s245_s12, %s246_s13  }
   0xe   :  { %s247_s16 = smov [#allocation5]  }
   0xf   :  { %s28_s17 = sshll.u32 %s247_s16, 4  ;;  %s29_s17 = int_to_ptr.vmem [resolvable:$true] %s28_s17 }
  0x10   :  { %s206_s18 = scalar_lea.vmem %s29_s17, 128  ;;  %p211_p6 = scmp.lt.s32.totalorder %s29_s17, %s29_s17 }
  0x11   :  { %p207_p5 = scmp.ne.s32.totalorder %s29_s17, %s206_s18  ;;  %p212_p7 = scmp.lt.s32.totalorder %s206_s18, %s206_s18 }
  0x13   :  { %p213_p8 = por %p212_p7, %p211_p6 }
  0x15   :  { %p214_p9 = pnand %p213_p8, %p207_p5 }
  0x17   :  { %217 = shalt.err (!%p214_p9)
}
  0x18   :  { %31 = dma.hbm_to_vmem [thread:$0]  %s289_s1, 128, %s29_s17, [#allocation6]  }
  0x19   :  { %238 = dma.done.wait [#allocation3], 256  }
  0x1a   :  { %239 = vsyncadd [#allocation3], 4294967040 }
  0x1b   :  { %240 = dma.done.wait [#allocation6], 128  }
  0x1c   :  { %241 = vsyncadd [#allocation6], 4294967168  ;;  %v52_v0 = vlaneseq  ;;  %v248_v1 = vmov 1966171168   ;;  %v46_v6 = vld [vmem:[#allocation5] sm:$0xff]  ;;  %vm145_vm0 = vcmask 254976  }
  0x1d   :  { %v50_v2 = vunpack.c.l.s4 %v248_v1  ;;  %v48_v9 = vcombine.high %v46_v6, %v46_v6  ;;  %v38_v13 = vld [vmem:[#allocation2] sm:$0x3]  ;;  %v39_v18 = vld [vmem:[#allocation2 + $0x2] sm:$0x3]  ;;  %v40_v19 = vld [vmem:[#allocation2 + $0x4] sm:$0x3] }
  0x1e   :  { %v53_v3 = vshrl.u32 %v52_v0, 7  ;;  %v42_v25 = vld [vmem:[#allocation2 + $0x8] sm:$0x3]  ;;  %v41_v26 = vld [vmem:[#allocation2 + $0x6] sm:$0x3]  ;;  %s249_s0 = smov [#allocation7]  }
  0x1f   :  { %v51_v4 = vunpack.c.0.s8 %v50_v2  ;;  %v43_v33 = vld [vmem:[#allocation2 + $0xa] sm:$0x3]  ;;  %v44_v34 = vld [vmem:[#allocation2 + $0xc] sm:$0x3]  ;;  %v45_v40 = vld [vmem:[#allocation2 + $0xe] sm:$0x3] }
  0x20   :  { %v99_v8 = vsub.s32 0, %v53_v3  ;;  %s159_s1 = sshll.u32 %s249_s0, 4  ;;  %s160_s1 = int_to_ptr.vmem [resolvable:$true] %s159_s1 }
  0x21   :  { %v54_v5 = vsub.s32 %v51_v4, %v53_v3  ;;  %s218_s21 = scalar_lea.vmem %s160_s1, 256  ;;  %p223_p11 = scmp.lt.s32.totalorder %s160_s1, %s160_s1 }
  0x22   :  { %p219_p10 = scmp.ne.s32.totalorder %s160_s1, %s218_s21  ;;  %p224_p12 = scmp.lt.s32.totalorder %s218_s21, %s218_s21 }
  0x23   :  { %v55_v7 = vrot.slane %v46_v6, %v54_v5  ;;  %v62_v12 = vrot.slane %v48_v9, %v54_v5 }
  0x24   :  { %p225_p13 = por %p224_p12, %p223_p11 }
  0x25   :  { %v71_v10 = vrot.slane %v55_v7, %v54_v5  ;;  %v63_v11 = vcombine.high %v55_v7, %v55_v7  ;;  %v78_v17 = vrot.slane %v62_v12, %v54_v5  ;;  %v64_v20 = vcombine.high %v62_v12, %v62_v12 }
  0x26   :  { %p226_p0 = pnand %p225_p13, %p219_p10 }
  0x27   :  { %v100_v14 = vrot.slane %v71_v10, %v99_v8  ;;  %v85_v15 = vrot.slane %v63_v11, %v54_v5  ;;  %v93_v16 = vcombine.high %v71_v10, %v71_v10  ;;  %v116_v27 = vrot.slane %v78_v17, %v99_v8 }
  0x28   :  { %v92_v28 = vrot.slane %v64_v20, %v54_v5  ;;  %v94_v29 = vcombine.high %v78_v17, %v78_v17 }
  0x29   :  { %v137_v21 = vadd.f32 %v100_v14, %v38_v13  ;;  %v104_v22 = vrot.slane %v85_v15, %v99_v8  ;;  %v108_v23 = vrot.slane %v93_v16, %v99_v8  ;;  %v95_v24 = vcombine.high %v85_v15, %v85_v15 }
  0x2a   :  { %v141_v35 = vadd.f32 %v116_v27, %v42_v25  ;;  %v120_v36 = vrot.slane %v92_v28, %v99_v8  ;;  %v124_v37 = vrot.slane %v94_v29, %v99_v8  ;;  %v96_v38 = vcombine.high %v92_v28, %v92_v28 }
  0x2b   :  { %146 = vst.msk [vmem:[#allocation7] sm:$0x3] %vm145_vm0, %v137_v21  ;;  %v138_v30 = vadd.f32 %v104_v22, %v39_v18  ;;  %v139_v31 = vadd.f32 %v108_v23, %v40_v19  ;;  %v112_v32 = vrot.slane %v95_v24, %v99_v8 }
  0x2c   :  { %150 = vst.msk [vmem:[#allocation7 + $0x8] sm:$0x3] %vm145_vm0, %v141_v35  ;;  %v142_v41 = vadd.f32 %v120_v36, %v43_v33  ;;  %v143_v42 = vadd.f32 %v124_v37, %v44_v34  ;;  %v128_v43 = vrot.slane %v96_v38, %v99_v8 }
  0x2d   :  { %147 = vst.msk [vmem:[#allocation7 + $0x2] sm:$0x3] %vm145_vm0, %v138_v30  ;;  %148 = vst.msk [vmem:[#allocation7 + $0x4] sm:$0x3] %vm145_vm0, %v139_v31  ;;  %v140_v39 = vadd.f32 %v112_v32, %v41_v26 }
  0x2e   :  { %151 = vst.msk [vmem:[#allocation7 + $0xa] sm:$0x3] %vm145_vm0, %v142_v41  ;;  %152 = vst.msk [vmem:[#allocation7 + $0xc] sm:$0x3] %vm145_vm0, %v143_v42  ;;  %v144_v44 = vadd.f32 %v128_v43, %v45_v40 }
  0x2f   :  { %149 = vst.msk [vmem:[#allocation7 + $0x6] sm:$0x3] %vm145_vm0, %v140_v39 }
  0x30   :  { %153 = vst.msk [vmem:[#allocation7 + $0xe] sm:$0x3] %vm145_vm0, %v144_v44 }
  0x31   :  { %229 = shalt.err (!%p226_p0)
}
  0x32   :  { %165 = dma.vmem_to_hbm [thread:$0]  %s160_s1, 256, %s290_s2, [#allocation4], %s245_s12, %s245_s12, %s246_s13  }
  0x33   :  { %242 = dma.done.wait [#allocation4], 256  }
  0x34   :  { %243 = vsyncadd [#allocation4], 4294967040 }
  0x35   :  { %169 = vsyncpa [#allocation3], 1 }
  0x36   :  { %170 = vsyncpa [#allocation6], 1 }
  0x37   :  { %171 = vsyncpa [#allocation4], 1 }

</bundles_post_ra>
